<compile_context>
chip_gen: v7x
topology: tpu7x:2x2x1
jax: 0.10.0
libtpu: 0.0.40
codegen_flags: <defaults>
</compile_context>

<pallas_src>
import math

import jax
import jax.numpy as jnp
from jax import lax
from jax.experimental import pallas as pl
from jax.experimental.pallas import tpu as pltpu


def _round_up(v, m):
    return (v + m - 1) // m * m


def _pad2(a, rows, cols):
    r, c = a.shape
    if r == rows and c == cols:
        return a
    return jnp.pad(a, ((0, rows - r), (0, cols - c)))


# ---------------- Phase A: edge = (G^T @ (x @ W + b)) @ W1 ----------------
def _edge_kernel(x_ref, g_ref, w_ref, w1_ref, b_ref, edge_ref, acc_ref):
    n = pl.program_id(1)  # node-tile (reduction) axis, innermost

    @pl.when(n == 0)
    def _init():
        acc_ref[...] = jnp.zeros_like(acc_ref)

    # h_tile = x_tile @ W + b : bf16 MXU operands, f32 accumulation,
    # bias add kept in f32 on the VPU (v5e has no bf16 VPU path).
    h = jnp.dot(x_ref[...], w_ref[...], preferred_element_type=jnp.float32)
    h = h + b_ref[...]

    # acc += G_tile^T @ h_tile without materializing a transpose:
    # contract the node axis (dim 0) of both operands directly on the MXU.
    acc_ref[...] += lax.dot_general(
        g_ref[...], h.astype(jnp.bfloat16),
        dimension_numbers=(((0,), (0,)), ((), ())),
        preferred_element_type=jnp.float32)

    @pl.when(n == pl.num_programs(1) - 1)
    def _finalize():
        edge = jnp.dot(acc_ref[...].astype(jnp.bfloat16), w1_ref[...],
                       preferred_element_type=jnp.float32)
        edge_ref[...] = edge.astype(edge_ref.dtype)


# ---------------- Phase B: out = G @ edge ----------------
def _out_kernel(g_ref, e_ref, out_ref, acc_ref):
    k = pl.program_id(1)  # edge-tile (reduction) axis, innermost

    @pl.when(k == 0)
    def _init():
        acc_ref[...] = jnp.zeros_like(acc_ref)

    acc_ref[...] += jnp.dot(g_ref[...], e_ref[...],
                            preferred_element_type=jnp.float32)

    @pl.when(k == pl.num_programs(1) - 1)
    def _finalize():
        out_ref[...] = acc_ref[...].astype(out_ref.dtype)


def hgnn_conv(x, G, W, W1, b=None, *, tile_n=256, tile_e=256):
    """x: (N, F), G: (N, E), W/W1: (F, F), b: (F,) or None."""
    N, F_in = x.shape
    N_g, E = G.shape
    assert N_g == N
    F_out = W.shape[1]
    # PyTorch module applies weight1 to the (E, out_ft) edge tensor, so the
    # module is only consistent when in_ft == out_ft.
    assert W1.shape == (F_out, F_out)
    if b is None:
        b = jnp.zeros((F_out,), dtype=jnp.float32)

    # Lane-dense padding: feature/edge dims to multiples of 128, node tiles
    # to multiples of 8.  Zero padding preserves the forward semantics.
    F_in_pad = _round_up(F_in, 128)
    F_out_pad = _round_up(F_out, 128)
    tn = min(tile_n, _round_up(N, 8))
    te = min(tile_e, _round_up(E, 128))
    N_pad = _round_up(N, tn)
    E_pad = _round_up(E, te)
    n_tiles = N_pad // tn
    e_tiles = E_pad // te

    # bf16 MXU operands; bias stays f32.
    x_p = _pad2(x, N_pad, F_in_pad).astype(jnp.bfloat16)
    G_p = _pad2(G, N_pad, E_pad).astype(jnp.bfloat16)
    W_p = _pad2(W, F_in_pad, F_out_pad).astype(jnp.bfloat16)
    W1_p = _pad2(W1, F_out_pad, F_out_pad).astype(jnp.bfloat16)
    b_p = _pad2(b.reshape(1, F_out).astype(jnp.float32), 1, F_out_pad)

    compiler_params = pltpu.CompilerParams(
        dimension_semantics=("parallel", "arbitrary"),
        vmem_limit_bytes=32 * 1024 * 1024,
    )

    # ---- Phase A ----
    flops_a = (2 * N_pad * F_in_pad * F_out_pad * e_tiles     # h recompute per E-tile
               + 2 * N_pad * E_pad * F_out_pad                # G^T @ h
               + 2 * E_pad * F_out_pad * F_out_pad)           # @ W1
    bytes_a = (x_p.size * 2 * e_tiles + G_p.size * 2 + W_p.size * 2
               + W1_p.size * 2 + b_p.size * 4 + E_pad * F_out_pad * 4)
    edge_pad = pl.pallas_call(
        _edge_kernel,
        out_shape=jax.ShapeDtypeStruct((E_pad, F_out_pad), jnp.float32),
        grid_spec=pltpu.PrefetchScalarGridSpec(
            num_scalar_prefetch=0,
            grid=(e_tiles, n_tiles),
            in_specs=[
                pl.BlockSpec((tn, F_in_pad), lambda e, n: (n, 0)),          # x
                pl.BlockSpec((tn, te), lambda e, n: (n, e)),                # G
                pl.BlockSpec((F_in_pad, F_out_pad), lambda e, n: (0, 0)),   # W (resident)
                pl.BlockSpec((F_out_pad, F_out_pad), lambda e, n: (0, 0)),  # W1 (resident)
                pl.BlockSpec((1, F_out_pad), lambda e, n: (0, 0)),          # bias
            ],
            out_specs=pl.BlockSpec((te, F_out_pad), lambda e, n: (e, 0)),
            scratch_shapes=[pltpu.VMEM((te, F_out_pad), jnp.float32)],
        ),
        compiler_params=compiler_params,
        cost_estimate=pl.CostEstimate(flops=flops_a, transcendentals=0,
                                      bytes_accessed=bytes_a),
    )(x_p, G_p, W_p, W1_p, b_p)

    # ---- Phase B ----
    edge_bf16 = edge_pad.astype(jnp.bfloat16)
    flops_b = 2 * N_pad * E_pad * F_out_pad
    bytes_b = G_p.size * 2 + edge_bf16.size * 2 + N_pad * F_out_pad * 4
    out_pad = pl.pallas_call(
        _out_kernel,
        out_shape=jax.ShapeDtypeStruct((N_pad, F_out_pad), jnp.float32),
        grid_spec=pltpu.PrefetchScalarGridSpec(
            num_scalar_prefetch=0,
            grid=(n_tiles, e_tiles),
            in_specs=[
                pl.BlockSpec((tn, te), lambda i, k: (i, k)),         # G
                pl.BlockSpec((te, F_out_pad), lambda i, k: (k, 0)),  # edge
            ],
            out_specs=pl.BlockSpec((tn, F_out_pad), lambda i, k: (i, 0)),
            scratch_shapes=[pltpu.VMEM((tn, F_out_pad), jnp.float32)],
        ),
        compiler_params=compiler_params,
        cost_estimate=pl.CostEstimate(flops=flops_b, transcendentals=0,
                                      bytes_accessed=bytes_b),
    )(G_p, edge_bf16)

    out = out_pad[:N, :F_out].astype(x.dtype)
    edge = edge_pad[:E, :F_out].astype(x.dtype)
    return out, edge


if __name__ == "__main__":
    # Small synthetic problem: N nodes, E hyperedges, F = in_ft = out_ft.
    N, E, F = 16, 8, 32
    dtype = jnp.float32

    key = jax.random.PRNGKey(0)
    k_x, k_g, k_w, k_w1, k_b = jax.random.split(key, 5)

    stdv = 1.0 / math.sqrt(F)  # mirrors reset_parameters()
    x = jax.random.normal(k_x, (N, F), dtype=dtype)
    G = jax.random.uniform(k_g, (N, E), dtype=dtype)
    W = jax.random.uniform(k_w, (F, F), dtype=dtype, minval=-stdv, maxval=stdv)
    W1 = jax.random.uniform(k_w1, (F, F), dtype=dtype, minval=-stdv, maxval=stdv)
    b = jax.random.uniform(k_b, (F,), dtype=dtype, minval=-stdv, maxval=stdv)

    out, edge = jax.block_until_ready(hgnn_conv(x, G, W, W1, b))

    # Pure-JAX f32 reference.  The kernel feeds bf16 operands to the MXU
    # (f32 accumulation), so compare with a relative-error norm.
    h_ref = x @ W + b
    edge_ref = (G.T @ h_ref) @ W1
    out_ref = G @ edge_ref

    def rel_err(a, r):
        return float(jnp.linalg.norm(a - r) / (jnp.linalg.norm(r) + 1e-12))

    assert rel_err(edge, edge_ref) < 2e-2, ("edge rel err", rel_err(edge, edge_ref))
    assert rel_err(out, out_ref) < 2e-2, ("out rel err", rel_err(out, out_ref))

    print("KERNEL_OK")
</pallas_src>

<mosaic_0001>
module attributes {stable_mosaic.version = 11 : i64} {
  func.func @_edge_kernel(%arg0: i32, %arg1: i32, %arg2: memref<16x128xbf16, #tpu.memory_space<vmem>>, %arg3: memref<16x128xbf16, #tpu.memory_space<vmem>>, %arg4: memref<128x128xbf16, #tpu.memory_space<vmem>>, %arg5: memref<128x128xbf16, #tpu.memory_space<vmem>>, %arg6: memref<1x128xf32, #tpu.memory_space<vmem>>, %arg7: memref<128x128xf32, #tpu.memory_space<vmem>>, %arg8: memref<128x128xf32, #tpu.memory_space<vmem>>) attributes {dimension_semantics = [#tpu.dimension_semantics<parallel>, #tpu.dimension_semantics<arbitrary>], iteration_bounds = array<i64: 1, 1>, scalar_prefetch = 0 : i64, scratch_operands = 1 : i64, tpu.core_type = #tpu.core_type<tc>, window_params = [{transform_indices = @transform_0, window_bounds = array<i64: 16, 128>}, {transform_indices = @transform_1, window_bounds = array<i64: 16, 128>}, {pipeline_mode = #tpu.pipeline_mode<synchronous>, transform_indices = @transform_2, window_bounds = array<i64: 128, 128>}, {pipeline_mode = #tpu.pipeline_mode<synchronous>, transform_indices = @transform_3, window_bounds = array<i64: 128, 128>}, {pipeline_mode = #tpu.pipeline_mode<synchronous>, transform_indices = @transform_4, window_bounds = array<i64: 1, 128>}, {transform_indices = @transform_5, window_bounds = array<i64: 128, 128>}]} {
    %c0_i32 = arith.constant 0 : i32
    %0 = arith.cmpi eq, %arg1, %c0_i32 : i32
    %1 = arith.extui %0 : i1 to i32
    %c0_i32_0 = arith.constant 0 : i32
    %2 = arith.cmpi ne, %1, %c0_i32_0 : i32
    scf.if %2 {
      %cst_15 = arith.constant 0.000000e+00 : f32
      %18 = vector.broadcast %cst_15 : f32 to vector<128x128xf32>
      %c0_16 = arith.constant 0 : index
      %c0_17 = arith.constant 0 : index
      %19 = vector.load %arg8[%c0_16, %c0_17] : memref<128x128xf32, #tpu.memory_space<vmem>>, vector<128x128xf32>
      tpu.vector_store %arg8[%c0_16, %c0_17], %18 {strides = array<i32>} : memref<128x128xf32, #tpu.memory_space<vmem>>, vector<128x128xf32>,
    } else {
    }
    %c0 = arith.constant 0 : index
    %c0_1 = arith.constant 0 : index
    %3 = vector.load %arg2[%c0, %c0_1] : memref<16x128xbf16, #tpu.memory_space<vmem>>, vector<16x128xbf16>
    %c0_2 = arith.constant 0 : index
    %c0_3 = arith.constant 0 : index
    %4 = vector.load %arg4[%c0_2, %c0_3] : memref<128x128xbf16, #tpu.memory_space<vmem>>, vector<128x128xbf16>
    %cst = arith.constant dense<0.000000e+00> : vector<16x128xf32>
    %5 = tpu.matmul %3, %4, %cst {dimension_numbers = #tpu.dot_dimension_numbers<[1], [0], [0], [1], [0, 0, 1, 1], [], []>} : vector<16x128xbf16>, vector<128x128xbf16>, vector<16x128xf32> -> vector<16x128xf32>
    %c0_4 = arith.constant 0 : index
    %c0_5 = arith.constant 0 : index
    %6 = vector.load %arg6[%c0_4, %c0_5] : memref<1x128xf32, #tpu.memory_space<vmem>>, vector<1x128xf32>
    %7 = vector.broadcast %6 : vector<1x128xf32> to vector<16x128xf32>
    %8 = arith.addf %5, %7 : vector<16x128xf32>
    %c0_6 = arith.constant 0 : index
    %c0_7 = arith.constant 0 : index
    %9 = vector.load %arg8[%c0_6, %c0_7] : memref<128x128xf32, #tpu.memory_space<vmem>>, vector<128x128xf32>
    %c0_8 = arith.constant 0 : index
    %c0_9 = arith.constant 0 : index
    %10 = vector.load %arg3[%c0_8, %c0_9] : memref<16x128xbf16, #tpu.memory_space<vmem>>, vector<16x128xbf16>
    %11 = arith.truncf %8 : vector<16x128xf32> to vector<16x128xbf16>
    %cst_10 = arith.constant dense<0.000000e+00> : vector<128x128xf32>
    %12 = tpu.matmul %10, %11, %cst_10 {dimension_numbers = #tpu.dot_dimension_numbers<[0], [0], [1], [1], [0, 1, 1, 1], [], []>} : vector<16x128xbf16>, vector<16x128xbf16>, vector<128x128xf32> -> vector<128x128xf32>
    %13 = arith.addf %9, %12 : vector<128x128xf32>
    %c0_11 = arith.constant 0 : index
    %c0_12 = arith.constant 0 : index
    %14 = vector.load %arg8[%c0_11, %c0_12] : memref<128x128xf32, #tpu.memory_space<vmem>>, vector<128x128xf32>
    tpu.vector_store %arg8[%c0_11, %c0_12], %13 {strides = array<i32>} : memref<128x128xf32, #tpu.memory_space<vmem>>, vector<128x128xf32>,
    %c0_i32_13 = arith.constant 0 : i32
    %15 = arith.cmpi eq, %arg1, %c0_i32_13 : i32
    %16 = arith.extui %15 : i1 to i32
    %c0_i32_14 = arith.constant 0 : i32
    %17 = arith.cmpi ne, %16, %c0_i32_14 : i32
    scf.if %17 {
      %c0_15 = arith.constant 0 : index
      %c0_16 = arith.constant 0 : index
      %18 = vector.load %arg8[%c0_15, %c0_16] : memref<128x128xf32, #tpu.memory_space<vmem>>, vector<128x128xf32>
      %19 = arith.truncf %18 : vector<128x128xf32> to vector<128x128xbf16>
      %c0_17 = arith.constant 0 : index
      %c0_18 = arith.constant 0 : index
      %20 = vector.load %arg5[%c0_17, %c0_18] : memref<128x128xbf16, #tpu.memory_space<vmem>>, vector<128x128xbf16>
      %cst_19 = arith.constant dense<0.000000e+00> : vector<128x128xf32>
      %21 = tpu.matmul %19, %20, %cst_19 {dimension_numbers = #tpu.dot_dimension_numbers<[1], [0], [0], [1], [0, 0, 1, 1], [], []>} : vector<128x128xbf16>, vector<128x128xbf16>, vector<128x128xf32> -> vector<128x128xf32>
      %c0_20 = arith.constant 0 : index
      %c0_21 = arith.constant 0 : index
      %22 = vector.load %arg7[%c0_20, %c0_21] : memref<128x128xf32, #tpu.memory_space<vmem>>, vector<128x128xf32>
      tpu.vector_store %arg7[%c0_20, %c0_21], %21 {strides = array<i32>} : memref<128x128xf32, #tpu.memory_space<vmem>>, vector<128x128xf32>,
    } else {
    }
    return
  }
  func.func @transform_0(%arg0: i32, %arg1: i32) -> (i32, i32) {
    %c0_i32 = arith.constant 0 : i32
    %c0_i32_0 = arith.constant 0 : i32
    return %arg1, %c0_i32 : i32, i32
  }
  func.func @transform_1(%arg0: i32, %arg1: i32) -> (i32, i32) {
    %c0_i32 = arith.constant 0 : i32
    return %arg1, %arg0 : i32, i32
  }
  func.func @transform_2(%arg0: i32, %arg1: i32) -> (i32, i32) {
    %c0_i32 = arith.constant 0 : i32
    %c0_i32_0 = arith.constant 0 : i32
    %c0_i32_1 = arith.constant 0 : i32
    return %c0_i32, %c0_i32_0 : i32, i32
  }
  func.func @transform_3(%arg0: i32, %arg1: i32) -> (i32, i32) {
    %c0_i32 = arith.constant 0 : i32
    %c0_i32_0 = arith.constant 0 : i32
    %c0_i32_1 = arith.constant 0 : i32
    return %c0_i32, %c0_i32_0 : i32, i32
  }
  func.func @transform_4(%arg0: i32, %arg1: i32) -> (i32, i32) {
    %c0_i32 = arith.constant 0 : i32
    %c0_i32_0 = arith.constant 0 : i32
    %c0_i32_1 = arith.constant 0 : i32
    return %c0_i32, %c0_i32_0 : i32, i32
  }
  func.func @transform_5(%arg0: i32, %arg1: i32) -> (i32, i32) {
    %c0_i32 = arith.constant 0 : i32
    %c0_i32_0 = arith.constant 0 : i32
    return %arg0, %c0_i32 : i32, i32
  }
}

</mosaic_0001>

<bundles_post_ra>
// kernel: tpu_custom_call.1
= control target key start
LH: loop header
LB: loop body
LE: loop exit
PB: predicated region body
PF: predicated region fallthrough
CT: control target
= control target key end

     0   :  { %10 = vsyncpa [#allocation4], 0  ;;  %s1052_s0 = inlined_call_operand.hbm [shape: bf16[16,128], index: 0, kind: input, shape index: {}]   ;;  %s1053_s1 = inlined_call_operand.hbm [shape: bf16[16,128], index: 1, kind: input, shape index: {}]   ;;  %s1054_s2 = inlined_call_operand.hbm [shape: bf16[128,128], index: 2, kind: input, shape index: {}]   ;;  %s1055_s3 = inlined_call_operand.hbm [shape: bf16[128,128], index: 3, kind: input, shape index: {}]   ;;  %s1056_s4 = inlined_call_operand.vmem [shape: f32[1,128], index: 4, kind: input, shape index: {}]   ;;  %s1057_s5 = inlined_call_operand.hbm [shape: f32[128,128], index: 5, kind: output, shape index: {}]  }
   0x1   :  { %11 = vsyncpa [#allocation7], 0 }
   0x2   :  { %12 = vsyncpa [#allocation10], 0 }
   0x3   :  { %13 = vsyncpa [#allocation5], 0  ;;  %s914_s18 = smov [#allocation6]   ;;  %s915_s20 = smov [#allocation3]  }
   0x4   :  { %s31_s19 = sshll.u32 %s914_s18, 4  ;;  %s19_s21 = sshll.u32 %s915_s20, 4  ;;  %s32_s19 = int_to_ptr.vmem [resolvable:$true] %s31_s19  ;;  %s955_s21 = int_to_ptr.vmem [resolvable:$true] %s19_s21 }
   0x5   :  { %s796_s24 = scalar_lea.hbm %s1053_s1, 128 }
   0x6   :  { %p797_p0 = scmp.ne.s32.totalorder %s1053_s1, %s796_s24  ;;  %p800_p1 = scmp.lt.u32.totalorder %s796_s24, %s1053_s1 }
   0x8   :  { %p802_p2 = pnand %p800_p1, %p797_p0 }
   0xa   :  { %805 = shalt.err (!%p802_p2)
}
   0xb   :  { %s806_s29 = scalar_lea.vmem %s32_s19, 128  ;;  %p811_p4 = scmp.lt.s32.totalorder %s32_s19, %s32_s19 }
   0xc   :  { %p807_p3 = scmp.ne.s32.totalorder %s32_s19, %s806_s29  ;;  %p812_p5 = scmp.lt.s32.totalorder %s806_s29, %s806_s29 }
   0xe   :  { %p813_p6 = por %p812_p5, %p811_p4 }
  0x10   :  { %p814_p7 = pnand %p813_p6, %p807_p3 }
  0x12   :  { %817 = shalt.err (!%p814_p7)
}
  0x13   :  { %s916_s30 = smov 64   ;;  %s917_s6 = smov 4  }
  0x14   :  { %37 = dma.hbm_to_vmem [thread:$0]  %s1053_s1, 128, %s32_s19, [#allocation7], %s916_s30, %s916_s30, %s917_s6  }
  0x15   :  { %s818_s11 = scalar_lea.hbm %s1052_s0, 128 }
  0x16   :  { %p819_p8 = scmp.ne.s32.totalorder %s1052_s0, %s818_s11  ;;  %p822_p9 = scmp.lt.u32.totalorder %s818_s11, %s1052_s0 }
  0x18   :  { %p824_p10 = pnand %p822_p9, %p819_p8 }
  0x1a   :  { %827 = shalt.err (!%p824_p10)
}
  0x1b   :  { %s828_s16 = scalar_lea.vmem %s955_s21, 128  ;;  %p833_p12 = scmp.lt.s32.totalorder %s955_s21, %s955_s21 }
  0x1c   :  { %p829_p11 = scmp.ne.s32.totalorder %s955_s21, %s828_s16  ;;  %p834_p13 = scmp.lt.s32.totalorder %s828_s16, %s828_s16 }
  0x1e   :  { %p835_p0 = por %p834_p13, %p833_p12 }
  0x20   :  { %p836_p1 = pnand %p835_p0, %p829_p11 }
  0x22   :  { %839 = shalt.err (!%p836_p1)
}
  0x23   :  { %25 = dma.hbm_to_vmem [thread:$0]  %s1052_s0, 128, %s955_s21, [#allocation4], %s916_s30, %s916_s30, %s917_s6  }
  0x24   :  { %s918_s18 = smov [#allocation8]   ;;  %s919_s20 = smov [#allocation9]  }
  0x25   :  { %s43_s19 = sshll.u32 %s918_s18, 4  ;;  %s55_s22 = sshll.u32 %s919_s20, 4  ;;  %s44_s19 = int_to_ptr.vmem [resolvable:$true] %s43_s19  ;;  %s992_s22 = int_to_ptr.vmem [resolvable:$true] %s55_s22 }
  0x26   :  { %s840_s25 = scalar_lea.hbm %s1054_s2, 1024 }
  0x27   :  { %p841_p2 = scmp.ne.s32.totalorder %s1054_s2, %s840_s25  ;;  %p844_p3 = scmp.lt.u32.totalorder %s840_s25, %s1054_s2 }
  0x29   :  { %p846_p4 = pnand %p844_p3, %p841_p2 }
  0x2b   :  { %849 = shalt.err (!%p846_p4)
}
  0x2c   :  { %s850_s0 = scalar_lea.vmem %s44_s19, 1024  ;;  %p855_p6 = scmp.lt.s32.totalorder %s44_s19, %s44_s19 }
  0x2d   :  { %p851_p5 = scmp.ne.s32.totalorder %s44_s19, %s850_s0  ;;  %p856_p7 = scmp.lt.s32.totalorder %s850_s0, %s850_s0 }
  0x2f   :  { %p857_p8 = por %p856_p7, %p855_p6 }
  0x31   :  { %p858_p9 = pnand %p857_p8, %p851_p5 }
  0x33   :  { %861 = shalt.err (!%p858_p9)
}
  0x34   :  { %49 = dma.hbm_to_vmem [thread:$0]  %s1054_s2, 1024, %s44_s19, [#allocation7], %s916_s30, %s916_s30, %s917_s6  }
  0x35   :  { %s862_s10 = scalar_lea.hbm %s1055_s3, 1024 }
  0x36   :  { %p863_p10 = scmp.ne.s32.totalorder %s1055_s3, %s862_s10  ;;  %p866_p11 = scmp.lt.u32.totalorder %s862_s10, %s1055_s3 }
  0x38   :  { %p868_p12 = pnand %p866_p11, %p863_p10 }
  0x3a   :  { %871 = shalt.err (!%p868_p12)
}
  0x3b   :  { %s872_s15 = scalar_lea.vmem %s992_s22, 1024  ;;  %p877_p0 = scmp.lt.s32.totalorder %s992_s22, %s992_s22 }
  0x3c   :  { %p873_p13 = scmp.ne.s32.totalorder %s992_s22, %s872_s15  ;;  %p878_p1 = scmp.lt.s32.totalorder %s872_s15, %s872_s15 }
  0x3e   :  { %p879_p2 = por %p878_p1, %p877_p0 }
  0x40   :  { %p880_p3 = pnand %p879_p2, %p873_p13 }
  0x42   :  { %883 = shalt.err (!%p880_p3)
}
  0x43   :  { %61 = dma.hbm_to_vmem [thread:$0]  %s1055_s3, 1024, %s992_s22, [#allocation10], %s916_s30, %s916_s30, %s917_s6  }
  0x44   :  { %906 = dma.done.wait [#allocation4], 128  }
  0x45   :  { %907 = vsyncadd [#allocation4], 4294967168 }
  0x46   :  { %908 = dma.done.wait [#allocation7], 1152  }
  0x47   :  { %909 = vsyncadd [#allocation7], 4294966144 }
  0x48   :  { %910 = dma.done.wait [#allocation10], 1024  }
  0x49   :  { %911 = vsyncadd [#allocation10], 4294966272  ;;  %v920_v0 = vmov 0.0   ;;  %vm921_vm0 = vmmov 0   ;;  %v778_v1 = vld [vmem:[#allocation8] sm:$0xff]   ;;  %v779_v2 = vld [vmem:[#allocation8 + $0x8] sm:$0xff]  }
  0x4a   :  { %696 = vmatprep.subr.bf16.mxu0 %v920_v0  ;;  %712 = vmatprep.mubr.msk.bf16.mxu0 %vm921_vm0, %v920_v0  ;;  %v780_v3 = vld [vmem:[#allocation8 + $0x10] sm:$0xff]   ;;  %v787_v4 = vld [vmem:[#allocation6] sm:$0xff]   ;;  %v782_v6 = vld [vmem:[#allocation8 + $0x20] sm:$0xff]   ;;  %vm258_vm1 = vcmask 130048  }
  0x4b   :  { %697 = vmatpush3.bf16.msra.mxu0 %v778_v1  ;;  %v781_v5 = vld [vmem:[#allocation8 + $0x18] sm:$0xff]   ;;  %242 = vxpose.xlu0.c.b16.start.end [1/1] (short) %v787_v4, 128  ;;  %v783_v7 = vld [vmem:[#allocation8 + $0x28] sm:$0xff]   ;;  %v784_v8 = vld [vmem:[#allocation8 + $0x30] sm:$0xff]  }
  0x4c   :  { %698 = vmatprep.subr.bf16.mxu0 %v920_v0  ;;  %v785_v9 = vld [vmem:[#allocation8 + $0x38] sm:$0xff]   ;;  %v786_v10 = vld [vmem:[#allocation3] sm:$0xff]   ;;  %v788_v22 = vld [vmem:[#allocation9] sm:$0xff]  }
  0x4d   :  { %v635_v13 = vld [vmem:[%s1056_s4] ss:$0 sm:$0xff]  ;;  %v789_v24 = vld [vmem:[#allocation9 + $0x8] sm:$0xff]   ;;  %v791_v27 = vld [vmem:[#allocation9 + $0x18] sm:$0xff]   ;;  %s922_s4 = smov [#allocation11]  }
  0x4e   :  { %v790_v26 = vld [vmem:[#allocation9 + $0x10] sm:$0xff]   ;;  %v792_v29 = vld [vmem:[#allocation9 + $0x20] sm:$0xff]   ;;  %v793_v31 = vld [vmem:[#allocation9 + $0x28] sm:$0xff]   ;;  %s621_s6 = sshll.u32 %s922_s4, 4  ;;  %s622_s6 = int_to_ptr.vmem [resolvable:$true] %s621_s6 }
  0x4f   :  { %699 = vmatpush3.bf16.msra.mxu0 %v779_v2  ;;  %v794_v32 = vld [vmem:[#allocation9 + $0x30] sm:$0xff]   ;;  %v795_v34 = vld [vmem:[#allocation9 + $0x38] sm:$0xff]   ;;  %s884_s1 = scalar_lea.vmem %s622_s6, 2048  ;;  %p889_p5 = scmp.lt.s32.totalorder %s622_s6, %s622_s6 }
  0x50   :  { %700 = vmatprep.subr.bf16.mxu0 %v920_v0  ;;  %p885_p4 = scmp.ne.s32.totalorder %s622_s6, %s884_s1  ;;  %p890_p6 = scmp.lt.s32.totalorder %s884_s1, %s884_s1 }
  0x52   :  { %p891_p7 = por %p890_p6, %p889_p5 }
  0x53   :  { %701 = vmatpush3.bf16.msra.mxu0 %v780_v3 }
  0x54   :  { %702 = vmatprep.subr.bf16.mxu0 %v920_v0  ;;  %p892_p8 = pnand %p891_p7, %p885_p4 }
  0x57   :  { %703 = vmatpush3.bf16.msra.mxu0 %v781_v5 }
  0x58   :  { %704 = vmatprep.subr.bf16.mxu0 %v920_v0 }
  0x5b   :  { %705 = vmatpush3.bf16.msra.mxu0 %v782_v6 }
  0x5c   :  { %706 = vmatprep.subr.bf16.mxu0 %v920_v0 }
  0x5f   :  { %707 = vmatpush3.bf16.msra.mxu0 %v783_v7 }
  0x60   :  { %708 = vmatprep.subr.bf16.mxu0 %v920_v0 }
  0x63   :  { %709 = vmatpush3.bf16.msra.mxu0 %v784_v8 }
  0x64   :  { %710 = vmatprep.subr.bf16.mxu0 %v920_v0 }
  0x67   :  { %711 = vmatpush3.bf16.msra.mxu0 %v785_v9 }
  0x6a   :  { %713 = vmatmul.mubr.bf16.vlgmr.msra.gmra.mrb[0].mxu0 %v786_v10 }
  0xb1   :  { %v250_v11 = vpop.trf.xlu0 }
  0xb2   :  { %718 = vmatprep.mubr.msk.bf16.mxu1 %vm258_vm1, %v250_v11 }
  0xb5   :  { %v251_v12 = vpop.trf.xlu0 }
  0xb9   :  { %v252_v16 = vpop.trf.xlu0 }
  0xbd   :  { %v253_v23 = vpop.trf.xlu0 }
  0xc1   :  { %v254_v25 = vpop.trf.xlu0 }
  0xc5   :  { %v255_v28 = vpop.trf.xlu0 }
  0xc9   :  { %v256_v30 = vpop.trf.xlu0 }
  0xcd   :  { %v257_v33 = vpop.trf.xlu0 }
 0x13d   :  { %v210_v14 = vpop.f32.mrb[0].mxu0 }
 0x13e   :  { %v714_v15 = vpop.f32.mrb[1].mxu0  ;;  %v211_v18 = vadd.f32 %v635_v13, %v210_v14 }
 0x13f   :  { %v213_v17 = vpop.f32.mrb[2].mxu0 }
 0x140   :  { %v214_v19 = vadd.f32 %v635_v13, %v213_v17  ;;  %v715_v20 = vpop.f32.mrb[3].mxu0 }
 0x142   :  { %v235_v21 = vpack.c.bf16 %v214_v19, %v211_v18 }
 0x144   :  { %716 = vmatprep.subr.bf16.mxu1 %v235_v21 }
 0x145   :  { %717 = vmatpush3.bf16.msra.mxu1 %v235_v21 }
 0x146   :  { %734 = vmatprep.subr.bf16.mxu1 %v788_v22 }
 0x148   :  { %719 = vmatmul.mubr.msk.bf16.vlgmr.msra.gmra.mrb[0].mxu1 %vm258_vm1, %v251_v12 }
 0x149   :  { %722 = vmatprep.mubr.msk.bf16.mxu1 %vm258_vm1, %v252_v16  ;;  %735 = vmatpush3.bf16.msra.mxu1 %v788_v22 }
 0x14a   :  { %736 = vmatprep.subr.bf16.mxu1 %v789_v24 }
 0x14d   :  { %737 = vmatpush3.bf16.msra.mxu1 %v789_v24 }
 0x14e   :  { %738 = vmatprep.subr.bf16.mxu1 %v790_v26 }
 0x150   :  { %723 = vmatmul.mubr.msk.bf16.gmra.mrb[4].mxu1 %vm258_vm1, %v253_v23 }
 0x151   :  { %726 = vmatprep.mubr.msk.bf16.mxu1 %vm258_vm1, %v254_v25  ;;  %739 = vmatpush3.bf16.msra.mxu1 %v790_v26 }
 0x152   :  { %740 = vmatprep.subr.bf16.mxu1 %v791_v27 }
 0x155   :  { %741 = vmatpush3.bf16.msra.mxu1 %v791_v27 }
 0x156   :  { %742 = vmatprep.subr.bf16.mxu1 %v792_v29 }
 0x158   :  { %727 = vmatmul.mubr.msk.bf16.gmra.mrb[8].mxu1 %vm258_vm1, %v255_v28 }
 0x159   :  { %730 = vmatprep.mubr.msk.bf16.mxu1 %vm258_vm1, %v256_v30  ;;  %743 = vmatpush3.bf16.msra.mxu1 %v792_v29 }
 0x15a   :  { %744 = vmatprep.subr.bf16.mxu1 %v793_v31 }
 0x15d   :  { %745 = vmatpush3.bf16.msra.mxu1 %v793_v31 }
 0x15e   :  { %746 = vmatprep.subr.bf16.mxu1 %v794_v32 }
 0x160   :  { %731 = vmatmul.mubr.msk.bf16.gmra.mrb[12].mxu1 %vm258_vm1, %v257_v33 }
 0x161   :  { %747 = vmatpush3.bf16.msra.mxu1 %v794_v32 }
 0x162   :  { %748 = vmatprep.subr.bf16.mxu1 %v795_v34 }
 0x165   :  { %749 = vmatpush3.bf16.msra.mxu1 %v795_v34 }
 0x21b   :  { %v720_v35 = vpop.f32.mrb[0].mxu1 }
 0x21c   :  { %v317_v36 = vpop.f32.mrb[1].mxu1 }
 0x21d   :  { %v721_v37 = vpop.f32.mrb[2].mxu1 }
 0x21e   :  { %v432_v38 = vpack.c.bf16 %v721_v37, %v720_v35  ;;  %v320_v39 = vpop.f32.mrb[3].mxu1 }
 0x21f   :  { %v431_v40 = vpack.c.bf16 %v320_v39, %v317_v36 }
 0x221   :  { %750 = vmatprep.mubr.bf16.mxu1 %v431_v40 }
 0x222   :  { %751 = vmatmul.mubr.bf16.vlgmr.msra.gmra.mrb[16].mxu1 %v432_v38 }
 0x223   :  { %v724_v41 = vpop.f32.mrb[4].mxu1 }
 0x224   :  { %v333_v42 = vpop.f32.mrb[5].mxu1 }
 0x225   :  { %v725_v43 = vpop.f32.mrb[6].mxu1 }
 0x226   :  { %v434_v44 = vpack.c.bf16 %v725_v43, %v724_v41  ;;  %v336_v45 = vpop.f32.mrb[7].mxu1 }
 0x227   :  { %v433_v46 = vpack.c.bf16 %v336_v45, %v333_v42 }
 0x229   :  { %754 = vmatprep.mubr.bf16.mxu1 %v433_v46 }
 0x22a   :  { %755 = vmatmul.mubr.bf16.gmra.mrb[20].mxu1 %v434_v44 }
 0x22b   :  { %v728_v47 = vpop.f32.mrb[8].mxu1 }
 0x22c   :  { %v349_v48 = vpop.f32.mrb[9].mxu1 }
 0x22d   :  { %v729_v49 = vpop.f32.mrb[10].mxu1 }
 0x22e   :  { %v436_v50 = vpack.c.bf16 %v729_v49, %v728_v47  ;;  %v352_v51 = vpop.f32.mrb[11].mxu1 }
 0x22f   :  { %v435_v52 = vpack.c.bf16 %v352_v51, %v349_v48 }
 0x231   :  { %758 = vmatprep.mubr.bf16.mxu1 %v435_v52 }
 0x232   :  { %759 = vmatmul.mubr.bf16.gmra.mrb[24].mxu1 %v436_v50 }
 0x233   :  { %v732_v53 = vpop.f32.mrb[12].mxu1 }
 0x234   :  { %v365_v54 = vpop.f32.mrb[13].mxu1 }
 0x235   :  { %v733_v55 = vpop.f32.mrb[14].mxu1 }
 0x236   :  { %v438_v56 = vpack.c.bf16 %v733_v55, %v732_v53  ;;  %v368_v57 = vpop.f32.mrb[15].mxu1 }
 0x237   :  { %v437_v58 = vpack.c.bf16 %v368_v57, %v365_v54 }
 0x239   :  { %762 = vmatprep.mubr.bf16.mxu1 %v437_v58 }
 0x23a   :  { %763 = vmatmul.mubr.bf16.gmra.mrb[28].mxu1 %v438_v56 }
 0x2f5   :  { %v752_v59 = vpop.f32.mrb[16].mxu1 }
 0x2f6   :  { %602 = vst [vmem:[#allocation11 + $0x10] sm:$0xff] %v752_v59  ;;  %v537_v60 = vpop.f32.mrb[17].mxu1 }
 0x2f7   :  { %600 = vst [vmem:[#allocation11] sm:$0xff] %v537_v60  ;;  %v753_v61 = vpop.f32.mrb[18].mxu1 }
 0x2f8   :  { %603 = vst [vmem:[#allocation11 + $0x18] sm:$0xff] %v753_v61  ;;  %v540_v62 = vpop.f32.mrb[19].mxu1 }
 0x2f9   :  { %601 = vst [vmem:[#allocation11 + $0x8] sm:$0xff] %v540_v62 }
 0x2fd   :  { %v756_v63 = vpop.f32.mrb[20].mxu1 }
 0x2fe   :  { %606 = vst [vmem:[#allocation11 + $0x30] sm:$0xff] %v756_v63  ;;  %v553_v0 = vpop.f32.mrb[21].mxu1 }
 0x2ff   :  { %604 = vst [vmem:[#allocation11 + $0x20] sm:$0xff] %v553_v0  ;;  %v757_v1 = vpop.f32.mrb[22].mxu1 }
 0x300   :  { %607 = vst [vmem:[#allocation11 + $0x38] sm:$0xff] %v757_v1  ;;  %v556_v2 = vpop.f32.mrb[23].mxu1 }
 0x301   :  { %605 = vst [vmem:[#allocation11 + $0x28] sm:$0xff] %v556_v2 }
 0x305   :  { %v760_v3 = vpop.f32.mrb[24].mxu1 }
 0x306   :  { %610 = vst [vmem:[#allocation11 + $0x50] sm:$0xff] %v760_v3  ;;  %v569_v4 = vpop.f32.mrb[25].mxu1 }
 0x307   :  { %608 = vst [vmem:[#allocation11 + $0x40] sm:$0xff] %v569_v4  ;;  %v761_v5 = vpop.f32.mrb[26].mxu1 }
 0x308   :  { %611 = vst [vmem:[#allocation11 + $0x58] sm:$0xff] %v761_v5  ;;  %v572_v6 = vpop.f32.mrb[27].mxu1 }
 0x309   :  { %609 = vst [vmem:[#allocation11 + $0x48] sm:$0xff] %v572_v6 }
 0x30d   :  { %v764_v7 = vpop.f32.mrb[28].mxu1 }
 0x30e   :  { %614 = vst [vmem:[#allocation11 + $0x70] sm:$0xff] %v764_v7  ;;  %v585_v8 = vpop.f32.mrb[29].mxu1 }
 0x30f   :  { %612 = vst [vmem:[#allocation11 + $0x60] sm:$0xff] %v585_v8  ;;  %v765_v9 = vpop.f32.mrb[30].mxu1 }
 0x310   :  { %615 = vst [vmem:[#allocation11 + $0x78] sm:$0xff] %v765_v9  ;;  %v588_v10 = vpop.f32.mrb[31].mxu1 }
 0x311   :  { %613 = vst [vmem:[#allocation11 + $0x68] sm:$0xff] %v588_v10 }
 0x312   :  { %895 = shalt.err (!%p892_p8)
}
 0x313   :  { %s896_s19 = scalar_lea.hbm %s1057_s5, 2048 }
 0x314   :  { %p897_p9 = scmp.ne.s32.totalorder %s1057_s5, %s896_s19  ;;  %p900_p10 = scmp.lt.u32.totalorder %s896_s19, %s1057_s5 }
 0x316   :  { %p902_p11 = pnand %p900_p10, %p897_p9 }
 0x318   :  { %905 = shalt.err (!%p902_p11)
}
 0x319   :  { %s923_s25 = smov 128   ;;  %s924_s26 = smov 8  }
 0x31a   :  { %627 = dma.vmem_to_hbm [thread:$0]  %s622_s6, 2048, %s1057_s5, [#allocation5], %s923_s25, %s923_s25, %s924_s26  }
 0x31b   :  { %912 = dma.done.wait [#allocation5], 2048  }
 0x31c   :  { %913 = vsyncadd [#allocation5], 4294965248 }
 0x31d   :  { %631 = vsyncpa [#allocation4], 1 }
 0x31e   :  { %632 = vsyncpa [#allocation7], 1 }
 0x31f   :  { %633 = vsyncpa [#allocation10], 1 }
 0x320   :  { %634 = vsyncpa [#allocation5], 1 }

</bundles_post_ra>
